<compile_context>
chip_gen: v5e
topology: v5e:2x2
jax: 0.10.0
libtpu: 0.0.40
codegen_flags: <defaults>
</compile_context>

<pallas_src>
import jax
import jax.numpy as jnp
from jax.experimental import pallas as pl
from jax.experimental.pallas import tpu as pltpu


def _round_up(x, m):
    return (x + m - 1) // m * m


def _patch_embed_kernel(xp_ref, w_ref, b_ref, o_ref):
    # xp_ref: (tm, K)  tile of flattened patches (compute dtype), streamed
    # w_ref : (K, tn)  projection weight tile, resident across the M sweep
    # b_ref : (1, tn)  bias (f32), resident across the M sweep
    # o_ref : (tm, tn)
    acc = jnp.dot(xp_ref[...], w_ref[...], preferred_element_type=jnp.float32)
    o_ref[...] = (acc + b_ref[...]).astype(o_ref.dtype)


def patch_embed(x, weight, bias, patch_size, *, compute_dtype=jnp.bfloat16,
                out_dtype=None, tile_m=1024, tile_n=2048,
                vmem_limit_bytes=None):
    """
    x      : [B, C, H, W]              (NCHW, like PyTorch)
    weight : [embed_dim, C, ph, pw]    (PyTorch Conv2d weight layout)
    bias   : [embed_dim]
    returns: [B, num_patches, embed_dim] in `out_dtype` (default: compute_dtype).

    compute_dtype=bfloat16 is the production path (MXU rate, half the HBM
    traffic); compute_dtype=float32 is a parity/testing path matching the
    PyTorch f32 Conv2d semantics.
    """
    B, C, H, W = x.shape
    ph, pw = patch_size
    assert H % ph == 0 and W % pw == 0
    gh, gw = H // ph, W // pw
    embed_dim = weight.shape[0]
    num_patches = gh * gw
    K = C * ph * pw
    M = B * num_patches
    N = embed_dim
    if out_dtype is None:
        out_dtype = compute_dtype

    # --- glue: patchify in (c, ph, pw) order to match the conv contraction ---
    # Cast first so the XLA transpose moves half the bytes (bf16 path).
    # TODO(synk): the patch-extraction transpose stays in XLA glue (NCHW input
    # forces it); fusing it into the Pallas pipeline needs manual strided DMAs
    # of (C, ph, W) strips + in-kernel relayout.  Accepting NHWC input upstream
    # would make patchify a free reshape.
    xc = x.astype(compute_dtype)
    xp = xc.reshape(B, C, gh, ph, gw, pw).transpose(0, 2, 4, 1, 3, 5).reshape(M, K)
    w = weight.reshape(embed_dim, K).T.astype(compute_dtype)   # [K, N], tiny pass
    b = bias.astype(jnp.float32).reshape(1, N)

    # --- tiling (no padding, no output slicing: zero extra HBM passes) ---
    tile_m = max(16, _round_up(tile_m, 16))        # sublane packing (bf16/f32)
    tm = M if M <= tile_m else tile_m              # full-dim block always legal
    grid_m = pl.cdiv(M, tm)                        # ragged last M tile is fine

    tile_n = max(128, _round_up(tile_n, 128))
    if N % 128 == 0 and N > tile_n:
        tn = tile_n                                # lane-dense N tiles (big embed_dim)
    else:
        tn = N                                     # block == full dim (always legal)
    grid_n = pl.cdiv(N, tn)

    grid = (grid_n, grid_m)                        # M innermost -> W/bias resident

    cost = pl.CostEstimate(
        flops=2 * M * K * N,
        transcendentals=0,
        bytes_accessed=(xp.size * xp.dtype.itemsize + w.size * w.dtype.itemsize
                        + b.size * b.dtype.itemsize
                        + M * N * jnp.dtype(out_dtype).itemsize),
    )

    # TODO(synk): pipeline_mode=pl.Buffered(1) on the resident W/bias specs
    # would drop their second VMEM buffer (cheap headroom on v7x's 64 MiB);
    # kept at default double-buffering here for portability.
    compiler_params = pltpu.CompilerParams(
        dimension_semantics=("parallel", "parallel"),
        vmem_limit_bytes=vmem_limit_bytes,
    )

    out = pl.pallas_call(
        _patch_embed_kernel,
        out_shape=jax.ShapeDtypeStruct((M, N), out_dtype),
        grid_spec=pl.GridSpec(
            grid=grid,
            in_specs=[
                pl.BlockSpec((tm, K), lambda j, i: (i, 0)),   # streamed over M
                pl.BlockSpec((K, tn), lambda j, i: (0, j)),   # resident per M sweep
                pl.BlockSpec((1, tn), lambda j, i: (0, j)),   # resident per M sweep
            ],
            out_specs=pl.BlockSpec((tm, tn), lambda j, i: (i, j)),
        ),
        compiler_params=compiler_params,
        cost_estimate=cost,
    )(xp, w, b)

    return out.reshape(B, num_patches, embed_dim)


if __name__ == "__main__":
    # Small, self-consistent config: img_size=16, patch_size=4, input_c=4, embed_dim=32
    B, C, H, W = 2, 4, 16, 16
    patch = (4, 4)
    embed_dim = 32

    key = jax.random.PRNGKey(0)
    kx, kw, kb = jax.random.split(key, 3)
    x = jax.random.normal(kx, (B, C, H, W), dtype=jnp.float32)
    # Deterministic parameters (shapes match nn.Conv2d(C, embed_dim, 4, 4))
    weight = jax.random.normal(kw, (embed_dim, C, patch[0], patch[1]), dtype=jnp.float32) * 0.02
    bias = jax.random.normal(kb, (embed_dim,), dtype=jnp.float32) * 0.02

    # plain-JAX f32 reference of the same conv-as-matmul
    gh, gw = H // patch[0], W // patch[1]
    xp_ref = x.reshape(B, C, gh, patch[0], gw, patch[1]).transpose(0, 2, 4, 1, 3, 5)
    xp_ref = xp_ref.reshape(B * gh * gw, C * patch[0] * patch[1])
    ref = (xp_ref @ weight.reshape(embed_dim, -1).T + bias).reshape(B, gh * gw, embed_dim)

    # production path: bf16 compute + bf16 output, f32 accumulation on the MXU
    out_bf16 = patch_embed(x, weight, bias, patch)
    jax.block_until_ready(out_bf16)
    assert out_bf16.shape == (B, gh * gw, embed_dim)
    assert out_bf16.dtype == jnp.bfloat16
    assert jnp.allclose(out_bf16.astype(jnp.float32), ref, atol=1e-2, rtol=1e-2)

    # parity path: exact f32 semantics of the PyTorch module
    out_f32 = patch_embed(x, weight, bias, patch,
                          compute_dtype=jnp.float32, out_dtype=jnp.float32)
    jax.block_until_ready(out_f32)
    assert out_f32.shape == (B, gh * gw, embed_dim)
    assert jnp.allclose(out_f32, ref, atol=1e-4, rtol=1e-4)

    print("KERNEL_OK")
</pallas_src>

<mosaic_0001>
module attributes {stable_mosaic.version = 11 : i64} {
  func.func @_patch_embed_kernel(%arg0: i32, %arg1: i32, %arg2: memref<32x64xbf16, #tpu.memory_space<vmem>>, %arg3: memref<64x32xbf16, #tpu.memory_space<vmem>>, %arg4: memref<1x32xf32, #tpu.memory_space<vmem>>, %arg5: memref<32x32xbf16, #tpu.memory_space<vmem>>) attributes {dimension_semantics = [#tpu.dimension_semantics<parallel>, #tpu.dimension_semantics<parallel>], iteration_bounds = array<i64: 1, 1>, scalar_prefetch = 0 : i64, scratch_operands = 0 : i64, tpu.core_type = #tpu.core_type<tc>, window_params = [{transform_indices = @transform_0, window_bounds = array<i64: 32, 64>}, {transform_indices = @transform_1, window_bounds = array<i64: 64, 32>}, {transform_indices = @transform_2, window_bounds = array<i64: 1, 32>}, {transform_indices = @transform_3, window_bounds = array<i64: 32, 32>}]} {
    %c0 = arith.constant 0 : index
    %c0_0 = arith.constant 0 : index
    %0 = vector.load %arg2[%c0, %c0_0] : memref<32x64xbf16, #tpu.memory_space<vmem>>, vector<32x64xbf16>
    %c0_1 = arith.constant 0 : index
    %c0_2 = arith.constant 0 : index
    %1 = vector.load %arg3[%c0_1, %c0_2] : memref<64x32xbf16, #tpu.memory_space<vmem>>, vector<64x32xbf16>
    %cst = arith.constant dense<0.000000e+00> : vector<32x32xf32>
    %2 = tpu.matmul %0, %1, %cst {dimension_numbers = #tpu.dot_dimension_numbers<[1], [0], [0], [1], [0, 0, 1, 1], [], []>} : vector<32x64xbf16>, vector<64x32xbf16>, vector<32x32xf32> -> vector<32x32xf32>
    %c0_3 = arith.constant 0 : index
    %c0_4 = arith.constant 0 : index
    %3 = vector.load %arg4[%c0_3, %c0_4] : memref<1x32xf32, #tpu.memory_space<vmem>>, vector<1x32xf32>
    %4 = vector.broadcast %3 : vector<1x32xf32> to vector<32x32xf32>
    %5 = arith.addf %2, %4 : vector<32x32xf32>
    %6 = arith.truncf %5 : vector<32x32xf32> to vector<32x32xbf16>
    %c0_5 = arith.constant 0 : index
    %c0_6 = arith.constant 0 : index
    %7 = vector.load %arg5[%c0_5, %c0_6] : memref<32x32xbf16, #tpu.memory_space<vmem>>, vector<32x32xbf16>
    tpu.vector_store %arg5[%c0_5, %c0_6], %6 {strides = array<i32>} : memref<32x32xbf16, #tpu.memory_space<vmem>>, vector<32x32xbf16>,
    return
  }
  func.func @transform_0(%arg0: i32, %arg1: i32) -> (i32, i32) {
    %c0_i32 = arith.constant 0 : i32
    %c0_i32_0 = arith.constant 0 : i32
    return %arg1, %c0_i32 : i32, i32
  }
  func.func @transform_1(%arg0: i32, %arg1: i32) -> (i32, i32) {
    %c0_i32 = arith.constant 0 : i32
    %c0_i32_0 = arith.constant 0 : i32
    return %c0_i32, %arg0 : i32, i32
  }
  func.func @transform_2(%arg0: i32, %arg1: i32) -> (i32, i32) {
    %c0_i32 = arith.constant 0 : i32
    %c0_i32_0 = arith.constant 0 : i32
    return %c0_i32, %arg0 : i32, i32
  }
  func.func @transform_3(%arg0: i32, %arg1: i32) -> (i32, i32) {
    %c0_i32 = arith.constant 0 : i32
    return %arg1, %arg0 : i32, i32
  }
}

</mosaic_0001>

<bundles_post_ra>
// kernel: tpu_custom_call.1
= control target key start
LH: loop header
LB: loop body
LE: loop exit
PB: predicated region body
PF: predicated region fallthrough
CT: control target
= control target key end

     0   :  { %s236_s0 = inlined_call_operand.vmem [shape: bf16[32,64], index: 0, kind: input, shape index: {}]   ;;  %s237_s1 = inlined_call_operand.vmem [shape: bf16[64,32], index: 1, kind: input, shape index: {}]   ;;  %s238_s2 = inlined_call_operand.vmem [shape: f32[1,32], index: 2, kind: input, shape index: {}]   ;;  %s239_s3 = inlined_call_operand.hbm [shape: bf16[32,32], index: 3, kind: output, shape index: {}]  }
   0x1   :  { %v150_v0 = vld [vmem:[%s237_s1 + $0x18] sm:$0xff]  ;;  %v149_v1 = vld [vmem:[%s237_s1 + $0x10] sm:$0xff] }
   0x2   :  { %77 = vmatpush.bf16.msra.mxu0 %v150_v0  ;;  %151 = vmatpush.bf16.msra.mxu1 %v150_v0 }
   0x3   :  { %8 = vsyncpa [#allocation3], 0  ;;  %v148_v2 = vld [vmem:[%s237_s1 + $0x8] sm:$0xff]  ;;  %v147_v3 = vld [vmem:[%s237_s1] sm:$0xff]  ;;  %vm66_vm0 = vcmask 523264   ;;  %vm96_vm1 = vcmask 257024  }
   0x4   :  { %v145_v4 = vld [vmem:[%s236_s0] sm:$0xff]  ;;  %v146_v5 = vld [vmem:[%s236_s0 + $0x8] sm:$0xff]  ;;  %s185_s0 = smov [#allocation2]   ;;  %s107_s28 = sshll.u32 %s239_s3, 4  ;;  %s108_s28 = int_to_ptr.hbm [resolvable:$true] %s107_s28 }
   0x5   :  { %v158_v6 = vld [vmem:[%s238_s2] ss:$0 sm:$0xff]  ;;  %s105_s1 = sshll.u32 %s185_s0, 4  ;;  %s186_s2 = smov 64   ;;  %s106_s1 = int_to_ptr.vmem [resolvable:$true] %s105_s1 }
   0x6   :  { %78 = vmatpush.bf16.msra.mxu0 %v149_v1  ;;  %152 = vmatpush.bf16.msra.mxu1 %v149_v1  ;;  %s187_s29 = smov 4  }
   0xa   :  { %79 = vmatpush.bf16.msra.mxu0 %v148_v2  ;;  %153 = vmatpush.bf16.msra.mxu1 %v148_v2 }
   0xe   :  { %80 = vmatpush.bf16.msra.mxu0 %v147_v3  ;;  %154 = vmatpush.bf16.msra.mxu1 %v147_v3 }
  0x11   :  { %143 = vmatmul.msk.bf16.vlgmr.msra.gmra.mxu0 %vm66_vm0, %v145_v4  ;;  %144 = vmatmul.msk.bf16.vlgmr.msra.gmra.mxu1 %vm66_vm0, %v146_v5 }
  0x8e   :  { %v82_v7 = vpop.f32.mrf.mxu0  ;;  %v87_v8 = vpop.f32.mrf.mxu1 }
  0x8f   :  { %v83_v9 = vadd.f32 %v158_v6, %v82_v7  ;;  %v88_v10 = vadd.f32 %v158_v6, %v87_v8 }
  0x91   :  { %v92_v11 = vpack.c.bf16 %v83_v9, %v83_v9  ;;  %v94_v12 = vpack.c.bf16 %v88_v10, %v88_v10 }
  0x93   :  { %97 = vst.msk [vmem:[#allocation2] sm:$0xf] %vm96_vm1, %v92_v11 }
  0x94   :  { %99 = vst.msk [vmem:[#allocation2 + $0x8] sm:$0xf] %vm96_vm1, %v94_v12 }
  0x96   :  { %v84_v13 = vpop.f32.mrf.mxu0  ;;  %v89_v14 = vpop.f32.mrf.mxu1 }
  0x97   :  { %v85_v15 = vadd.f32 %v158_v6, %v84_v13  ;;  %v90_v16 = vadd.f32 %v158_v6, %v89_v14 }
  0x99   :  { %v93_v17 = vpack.c.bf16 %v85_v15, %v85_v15  ;;  %v95_v18 = vpack.c.bf16 %v90_v16, %v90_v16 }
  0x9b   :  { %98 = vst.msk [vmem:[#allocation2 + $0x4] sm:$0xf] %vm96_vm1, %v93_v17 }
  0x9c   :  { %100 = vst.msk [vmem:[#allocation2 + $0xc] sm:$0xf] %vm96_vm1, %v95_v18 }
  0x9d   :  { %113 = dma.vmem_to_hbm [thread:$0]  %s106_s1, 256, %s108_s28, [#allocation3], %s186_s2, %s186_s2, %s187_s29  }
  0x9e   :  { %183 = dma.done.wait [#allocation3], 256  }
  0x9f   :  { %184 = vsyncadd [#allocation3], 4294967040 }
  0xa0   :  { %118 = vsyncpa [#allocation3], 1 }

</bundles_post_ra>
